<compile_context>
chip_gen: v6e
topology: v6e:2x2x1
jax: 0.10.0
libtpu: 0.0.40
codegen_flags: <defaults>
</compile_context>

<pallas_src>
import functools

import jax
import jax.numpy as jnp
from jax import lax
from jax.experimental import pallas as pl
from jax.experimental.pallas import tpu as pltpu


def _round_up(x, m):
    return ((x + m - 1) // m) * m


def _combined_loss_kernel(p_ref, t_ref, o_ref, acc_ref, *,
                          rows_valid, tile_rows, lanes, blocks_per_part,
                          need_row_mask):
    c = pl.program_id(0)   # partition axis ("parallel" -> megacore split on v7x)
    i = pl.program_id(1)   # reduction axis ("arbitrary")

    @pl.when(i == 0)
    def _init():
        acc_ref[...] = jnp.zeros_like(acc_ref)

    # Fused |d| + d^2 on the whole tile (pure VPU).  Inputs stay in their HBM dtype
    # (e.g. bf16) and are upcast to f32 only in-register.
    d = p_ref[...].astype(jnp.float32) - t_ref[...].astype(jnp.float32)
    vals = jnp.abs(d) + d * d

    if need_row_mask:
        # Mask rows past the logical end (ragged last block / overhang blocks whose
        # index_map is clamped).  Only compiled in when the tiling is not exact.
        blk = c * blocks_per_part + i
        row0 = blk * tile_rows
        row_idx = row0 + lax.broadcasted_iota(jnp.int32, (tile_rows, lanes), 0)
        vals = jnp.where(row_idx < rows_valid, vals, jnp.float32(0.0))

    # Vector accumulator: per-step work is elementwise VPU adds only.
    acc_ref[...] += vals

    # Epilogue: one cross-sublane reduce per partition, written as a lane-dense
    # (8,128) partial block (row 0 holds the per-lane sums, other rows are zero).
    @pl.when(i == pl.num_programs(1) - 1)
    def _fin():
        col = jnp.sum(acc_ref[...], axis=0, keepdims=True)           # (1, lanes)
        row_id = lax.broadcasted_iota(jnp.int32, (8, lanes), 0)
        o_ref[...] = jnp.where(row_id == 0, col, jnp.float32(0.0))    # (8, lanes)


def combined_loss(preds, targets, *, tile_rows=2048, lanes=128, num_parts=2):
    """mean(|p - t|) + mean((p - t)^2), computed in a single Pallas TPU kernel."""
    assert preds.shape == targets.shape, "preds/targets must have the same shape"
    assert tile_rows % 8 == 0 and tile_rows > 0
    n_elems = preds.size
    assert n_elems > 0

    p_flat = preds.reshape(-1)
    t_flat = targets.reshape(-1)

    if n_elems % lanes == 0:
        # Free reshape of a contiguous buffer -> no extra HBM traffic.
        p2 = p_flat.reshape(-1, lanes)
        t2 = t_flat.reshape(-1, lanes)
    else:
        # Rare ragged-lane fallback: pad < 128 zeros (zeros contribute 0 to the sum).
        pad = (-n_elems) % lanes
        p2 = jnp.pad(p_flat, (0, pad)).reshape(-1, lanes)
        t2 = jnp.pad(t_flat, (0, pad)).reshape(-1, lanes)

    rows = p2.shape[0]
    # Block sublane size: big for large inputs, shrunk (but kept a multiple of 8) for
    # small ones so we never allocate a huge block for a tiny array.
    tr = min(tile_rows, _round_up(rows, 8))
    total_blocks = pl.cdiv(rows, tr)
    # Don't launch dead partitions when there is almost no work.
    num_parts = max(1, min(num_parts, total_blocks))
    bpp = pl.cdiv(total_blocks, num_parts)            # blocks handled per partition
    grid = (num_parts, bpp)

    # Only pay for in-kernel masking when the tiling is not exact.
    need_row_mask = (rows % tr != 0) or (num_parts * bpp != total_blocks)

    def in_map(c, i):
        # Clamp so we never request a block start past the array; the kernel's row
        # mask (based on the *logical* block id) zeroes any such contribution.
        return (jnp.minimum(c * bpp + i, total_blocks - 1), 0)

    kernel = functools.partial(
        _combined_loss_kernel,
        rows_valid=rows, tile_rows=tr, lanes=lanes, blocks_per_part=bpp,
        need_row_mask=need_row_mask)

    partials = pl.pallas_call(
        kernel,
        out_shape=jax.ShapeDtypeStruct((num_parts * 8, lanes), jnp.float32),
        grid_spec=pltpu.PrefetchScalarGridSpec(
            num_scalar_prefetch=0,
            grid=grid,
            in_specs=[
                pl.BlockSpec((tr, lanes), in_map),
                pl.BlockSpec((tr, lanes), in_map),
            ],
            # One (8,128) partial block per partition -> no cross-core write races.
            out_specs=pl.BlockSpec((8, lanes), lambda c, i: (c, 0)),
            scratch_shapes=[pltpu.VMEM((tr, lanes), jnp.float32)],
        ),
        compiler_params=pltpu.CompilerParams(
            dimension_semantics=("parallel", "arbitrary"),
        ),
    )(p2, t2)

    # Tiny wrapper-side finish: sum the (num_parts*8, 128) partials and normalize.
    loss = jnp.sum(partials) * (1.0 / n_elems)
    # Match PyTorch: scalar loss in the input dtype.
    return loss.astype(preds.dtype)


if __name__ == "__main__":
    key = jax.random.PRNGKey(0)
    kp, kt = jax.random.split(key)

    # Small regression-like shapes consistent with the module's usage.
    preds = jax.random.normal(kp, (2, 4, 16, 16), dtype=jnp.float32)
    targets = jax.random.normal(kt, (2, 4, 16, 16), dtype=jnp.float32)

    loss = combined_loss(preds, targets)
    jax.block_until_ready(loss)

    # Pure-JAX reference check (L1Loss + MSELoss, both mean-reduced).
    d = preds - targets
    ref = jnp.mean(jnp.abs(d)) + jnp.mean(d * d)
    assert jnp.allclose(loss, ref, rtol=1e-5, atol=1e-5), (loss, ref)

    print("KERNEL_OK")
</pallas_src>

<mosaic_0001>
module attributes {stable_mosaic.version = 11 : i64} {
  func.func @_combined_loss_kernel(%arg0: i32, %arg1: i32, %arg2: memref<16x128xf32, #tpu.memory_space<vmem>>, %arg3: memref<16x128xf32, #tpu.memory_space<vmem>>, %arg4: memref<8x128xf32, #tpu.memory_space<vmem>>, %arg5: memref<16x128xf32, #tpu.memory_space<vmem>>) attributes {dimension_semantics = [#tpu.dimension_semantics<parallel>, #tpu.dimension_semantics<arbitrary>], iteration_bounds = array<i64: 1, 1>, scalar_prefetch = 0 : i64, scratch_operands = 1 : i64, tpu.core_type = #tpu.core_type<tc>, window_params = [{transform_indices = @transform_0, window_bounds = array<i64: 16, 128>}, {transform_indices = @transform_1, window_bounds = array<i64: 16, 128>}, {transform_indices = @transform_2, window_bounds = array<i64: 8, 128>}]} {
    %c0_i32 = arith.constant 0 : i32
    %0 = arith.cmpi eq, %arg1, %c0_i32 : i32
    %1 = arith.extui %0 : i1 to i32
    %c0_i32_0 = arith.constant 0 : i32
    %2 = arith.cmpi ne, %1, %c0_i32_0 : i32
    scf.if %2 {
      %cst = arith.constant 0.000000e+00 : f32
      %15 = vector.broadcast %cst : f32 to vector<16x128xf32>
      %c0_10 = arith.constant 0 : index
      %c0_11 = arith.constant 0 : index
      %16 = vector.load %arg5[%c0_10, %c0_11] : memref<16x128xf32, #tpu.memory_space<vmem>>, vector<16x128xf32>
      tpu.vector_store %arg5[%c0_10, %c0_11], %15 {strides = array<i32>} : memref<16x128xf32, #tpu.memory_space<vmem>>, vector<16x128xf32>,
    } else {
    }
    %c0 = arith.constant 0 : index
    %c0_1 = arith.constant 0 : index
    %3 = vector.load %arg2[%c0, %c0_1] : memref<16x128xf32, #tpu.memory_space<vmem>>, vector<16x128xf32>
    %c0_2 = arith.constant 0 : index
    %c0_3 = arith.constant 0 : index
    %4 = vector.load %arg3[%c0_2, %c0_3] : memref<16x128xf32, #tpu.memory_space<vmem>>, vector<16x128xf32>
    %5 = arith.subf %3, %4 : vector<16x128xf32>
    %6 = math.absf %5 : vector<16x128xf32>
    %7 = arith.mulf %5, %5 : vector<16x128xf32>
    %8 = arith.addf %6, %7 : vector<16x128xf32>
    %c0_4 = arith.constant 0 : index
    %c0_5 = arith.constant 0 : index
    %9 = vector.load %arg5[%c0_4, %c0_5] : memref<16x128xf32, #tpu.memory_space<vmem>>, vector<16x128xf32>
    %10 = arith.addf %9, %8 : vector<16x128xf32>
    %c0_6 = arith.constant 0 : index
    %c0_7 = arith.constant 0 : index
    %11 = vector.load %arg5[%c0_6, %c0_7] : memref<16x128xf32, #tpu.memory_space<vmem>>, vector<16x128xf32>
    tpu.vector_store %arg5[%c0_6, %c0_7], %10 {strides = array<i32>} : memref<16x128xf32, #tpu.memory_space<vmem>>, vector<16x128xf32>,
    %c0_i32_8 = arith.constant 0 : i32
    %12 = arith.cmpi eq, %arg1, %c0_i32_8 : i32
    %13 = arith.extui %12 : i1 to i32
    %c0_i32_9 = arith.constant 0 : i32
    %14 = arith.cmpi ne, %13, %c0_i32_9 : i32
    scf.if %14 {
      %c0_10 = arith.constant 0 : index
      %c0_11 = arith.constant 0 : index
      %15 = vector.load %arg5[%c0_10, %c0_11] : memref<16x128xf32, #tpu.memory_space<vmem>>, vector<16x128xf32>
      %cst = arith.constant dense<0.000000e+00> : vector<128xf32>
      %16 = vector.multi_reduction <add>, %15, %cst [0] : vector<16x128xf32> to vector<128xf32>
      %17 = vector.shape_cast %16 : vector<128xf32> to vector<1x128xf32>
      %18 = tpu.iota {dimensions = array<i32: 0>} : vector<8x128xi32>
      %c0_i32_12 = arith.constant 0 : i32
      %19 = vector.broadcast %c0_i32_12 : i32 to vector<8x128xi32>
      %20 = arith.cmpi eq, %18, %19 : vector<8x128xi32>
      %cst_13 = arith.constant 0.000000e+00 : f32
      %21 = vector.shape_cast %17 : vector<1x128xf32> to vector<1x128xf32>
      %22 = vector.broadcast %21 : vector<1x128xf32> to vector<8x128xf32>
      %23 = vector.broadcast %cst_13 : f32 to vector<8x128xf32>
      %24 = arith.select %20, %22, %23 : vector<8x128xi1>, vector<8x128xf32>
      %c0_14 = arith.constant 0 : index
      %c0_15 = arith.constant 0 : index
      %25 = vector.load %arg4[%c0_14, %c0_15] : memref<8x128xf32, #tpu.memory_space<vmem>>, vector<8x128xf32>
      tpu.vector_store %arg4[%c0_14, %c0_15], %24 {strides = array<i32>} : memref<8x128xf32, #tpu.memory_space<vmem>>, vector<8x128xf32>,
    } else {
    }
    return
  }
  func.func @transform_0(%arg0: i32, %arg1: i32) -> (i32, i32) {
    %c1_i32 = arith.constant 1 : i32
    %0 = arith.muli %arg0, %c1_i32 : i32
    %1 = arith.addi %0, %arg1 : i32
    %c0_i32 = arith.constant 0 : i32
    %2 = arith.minsi %1, %c0_i32 : i32
    %c0_i32_0 = arith.constant 0 : i32
    %c0_i32_1 = arith.constant 0 : i32
    return %2, %c0_i32_0 : i32, i32
  }
  func.func @transform_1(%arg0: i32, %arg1: i32) -> (i32, i32) {
    %c1_i32 = arith.constant 1 : i32
    %0 = arith.muli %arg0, %c1_i32 : i32
    %1 = arith.addi %0, %arg1 : i32
    %c0_i32 = arith.constant 0 : i32
    %2 = arith.minsi %1, %c0_i32 : i32
    %c0_i32_0 = arith.constant 0 : i32
    %c0_i32_1 = arith.constant 0 : i32
    return %2, %c0_i32_0 : i32, i32
  }
  func.func @transform_2(%arg0: i32, %arg1: i32) -> (i32, i32) {
    %c0_i32 = arith.constant 0 : i32
    %c0_i32_0 = arith.constant 0 : i32
    return %arg0, %c0_i32 : i32, i32
  }
}

</mosaic_0001>

<bundles_post_ra>
// kernel: tpu_custom_call.1
= control target key start
LH: loop header
LB: loop body
LE: loop exit
PB: predicated region body
PF: predicated region fallthrough
CT: control target
= control target key end

     0   :  { %7 = vsyncpa [#allocation4], 0  ;;  %s221_s0 = inlined_call_operand.hbm [shape: f32[16,128], index: 0, kind: input, shape index: {}]   ;;  %s222_s1 = inlined_call_operand.hbm [shape: f32[16,128], index: 1, kind: input, shape index: {}]   ;;  %s223_s2 = inlined_call_operand.hbm [shape: f32[8,128], index: 2, kind: output, shape index: {}]  }
   0x1   :  { %8 = vsyncpa [#allocation7], 0 }
   0x2   :  { %9 = vsyncpa [#allocation5], 0  ;;  %s192_s9 = smov [#allocation3]  }
   0x3   :  { %s21_s10 = sshll.u32 %s192_s9, 4  ;;  %s22_s10 = int_to_ptr.vmem [resolvable:$true] %s21_s10 }
   0x4   :  { %s134_s11 = scalar_lea.vmem %s22_s10, 256  ;;  %p139_p1 = scmp.lt.s32.totalorder %s22_s10, %s22_s10 }
   0x5   :  { %p135_p0 = scmp.ne.s32.totalorder %s22_s10, %s134_s11  ;;  %p140_p2 = scmp.lt.s32.totalorder %s134_s11, %s134_s11 }
   0x7   :  { %p141_p3 = por %p140_p2, %p139_p1 }
   0x9   :  { %p142_p4 = pnand %p141_p3, %p135_p0 }
   0xb   :  { %145 = shalt.err (!%p142_p4)
}
   0xc   :  { %s193_s12 = smov 128   ;;  %s194_s13 = smov 8  }
   0xd   :  { %27 = dma.hbm_to_vmem [thread:$0]  %s221_s0, 256, %s22_s10, [#allocation4], %s193_s12, %s193_s12, %s194_s13  }
   0xe   :  { %s195_s16 = smov [#allocation6]  }
   0xf   :  { %s39_s17 = sshll.u32 %s195_s16, 4  ;;  %s40_s17 = int_to_ptr.vmem [resolvable:$true] %s39_s17 }
  0x10   :  { %s154_s18 = scalar_lea.vmem %s40_s17, 256  ;;  %p159_p6 = scmp.lt.s32.totalorder %s40_s17, %s40_s17 }
  0x11   :  { %p155_p5 = scmp.ne.s32.totalorder %s40_s17, %s154_s18  ;;  %p160_p7 = scmp.lt.s32.totalorder %s154_s18, %s154_s18 }
  0x13   :  { %p161_p8 = por %p160_p7, %p159_p6 }
  0x15   :  { %p162_p9 = pnand %p161_p8, %p155_p5 }
  0x17   :  { %165 = shalt.err (!%p162_p9)
}
  0x18   :  { %45 = dma.hbm_to_vmem [thread:$0]  %s222_s1, 256, %s40_s17, [#allocation7], %s193_s12, %s193_s12, %s194_s13  }
  0x19   :  { %186 = dma.done.wait [#allocation4], 256  }
  0x1a   :  { %187 = vsyncadd [#allocation4], 4294967040 }
  0x1b   :  { %188 = dma.done.wait [#allocation7], 256  }
  0x1c   :  { %189 = vsyncadd [#allocation7], 4294967040  ;;  %v66_v0 = vld [vmem:[#allocation3] sm:$0xff]  ;;  %v67_v1 = vld [vmem:[#allocation3 + $0x8] sm:$0xff]  ;;  %v96_v14 = vlaneseq  ;;  %s196_s0 = smov [#allocation8]  }
  0x1d   :  { %v68_v2 = vld [vmem:[#allocation6] sm:$0xff]  ;;  %v69_v3 = vld [vmem:[#allocation6 + $0x8] sm:$0xff]  ;;  %s107_s1 = sshll.u32 %s196_s0, 4  ;;  %s108_s1 = int_to_ptr.vmem [resolvable:$true] %s107_s1 }
  0x1e   :  { %v70_v4 = vsub.f32 %v66_v0, %v68_v2  ;;  %v71_v5 = vsub.f32 %v67_v1, %v69_v3  ;;  %v97_v17 = vshrl.u32 %v96_v14, 7  ;;  %s166_s21 = scalar_lea.vmem %s108_s1, 128  ;;  %p171_p11 = scmp.lt.s32.totalorder %s108_s1, %s108_s1 }
  0x1f   :  { %p167_p10 = scmp.ne.s32.totalorder %s108_s1, %s166_s21  ;;  %p172_p12 = scmp.lt.s32.totalorder %s166_s21, %s166_s21 }
  0x20   :  { %v72_v6 = vand.u32 2147483647, %v70_v4  ;;  %v74_v7 = vmul.f32 %v70_v4, %v70_v4  ;;  %v73_v8 = vand.u32 2147483647, %v71_v5  ;;  %v75_v9 = vmul.f32 %v71_v5, %v71_v5 }
  0x21   :  { %vm98_vm0 = vcmp.eq.s32.totalorder %v97_v17, 0  ;;  %p173_p13 = por %p172_p12, %p171_p11 }
  0x22   :  { %v76_v10 = vadd.f32 %v74_v7, %v72_v6  ;;  %v77_v11 = vadd.f32 %v75_v9, %v73_v8 }
  0x23   :  { %p174_p0 = pnand %p173_p13, %p167_p10 }
  0x24   :  { %v89_v12 = vadd.f32 %v77_v11, %v76_v10 }
  0x26   :  { %v90_v13 = vrot.slane %v89_v12, 4 }
  0x28   :  { %v91_v15 = vadd.f32 %v90_v13, %v89_v12 }
  0x2a   :  { %v92_v16 = vrot.slane %v91_v15, 2 }
  0x2c   :  { %v93_v18 = vadd.f32 %v92_v16, %v91_v15 }
  0x2e   :  { %v94_v19 = vrot.slane %v93_v18, 1 }
  0x30   :  { %v95_v20 = vadd.f32 %v94_v19, %v93_v18 }
  0x32   :  { %v99_v21 = vsel %vm98_vm0, %v95_v20, 0.0 }
  0x33   :  { %100 = vst [vmem:[#allocation8] sm:$0xff] %v99_v21 }
  0x34   :  { %177 = shalt.err (!%p174_p0)
}
  0x35   :  { %110 = dma.vmem_to_hbm [thread:$0]  %s108_s1, 128, %s223_s2, [#allocation5]  }
  0x36   :  { %190 = dma.done.wait [#allocation5], 128  }
  0x37   :  { %191 = vsyncadd [#allocation5], 4294967168 }
  0x38   :  { %114 = vsyncpa [#allocation4], 1 }
  0x39   :  { %115 = vsyncpa [#allocation7], 1 }
  0x3a   :  { %116 = vsyncpa [#allocation5], 1 }

</bundles_post_ra>
